<compile_context>
chip_gen: v7x
topology: tpu7x:2x2x1
jax: 0.10.0
libtpu: 0.0.40
codegen_flags: <defaults>
</compile_context>

<pallas_src>
import math
import functools

import jax
import jax.numpy as jnp
from jax.experimental import pallas as pl
from jax.experimental.pallas import tpu as pltpu


# ----------------------------- Pallas kernel ---------------------------------

def _layer_norm(x, gamma, beta, eps=1e-5):
    # LayerNorm over the last axis (biased variance, like torch.nn.LayerNorm).
    mean = jnp.mean(x, axis=-1, keepdims=True)
    var = jnp.mean((x - mean) ** 2, axis=-1, keepdims=True)
    return (x - mean) * jax.lax.rsqrt(var + eps) * gamma + beta


def encoder_block_kernel(num_heads,
                         vl_ref,                       # scalar-prefetch: (B,) int32 in SMEM
                         x_ref,
                         wqkv_ref, wo_ref,
                         ln1_g_ref, ln1_b_ref,
                         w1_ref, b1_ref, w2_ref, b2_ref,
                         ln2_g_ref, ln2_b_ref,
                         o_ref):
    b = pl.program_id(0)
    x = x_ref[0]                                        # (S, H) f32 for this batch element
    S, H = x.shape
    NH = num_heads

    # --- multi-head self-attention: Q,K,V for all heads in ONE batched MXU issue ---
    # wqkv is (3*NH, H, dh); the Wq slice already carries 1/sqrt(dh).
    xb = jnp.broadcast_to(x, (3 * NH, S, H))            # broadcast along major axis (cheap)
    qkv = jnp.einsum('hsk,hkd->hsd', xb, wqkv_ref[...],
                     preferred_element_type=jnp.float32)    # (3*NH, S, dh)
    q = qkv[:NH]                                        # static major-axis slices (no relayout)
    k = qkv[NH:2 * NH]
    v = qkv[2 * NH:]

    scores = jnp.einsum('hqd,hkd->hqk', q, k,
                        preferred_element_type=jnp.float32)  # (NH, S, S)

    # masked_softmax: keys >= valid_len get -1e6 before softmax over the key axis.
    valid_len = vl_ref[b]
    key_ids = jax.lax.broadcasted_iota(jnp.int32, (S, S), 1)
    keep = (key_ids < valid_len)[None, :, :]            # (1, S_q, S_k) -> broadcast over heads
    scores = jnp.where(keep, scores, -1000000.0)

    scores = scores - jnp.max(scores, axis=-1, keepdims=True)
    p = jnp.exp(scores)
    attn = p * pl.reciprocal(jnp.sum(p, axis=-1, keepdims=True), approx=True)

    ctx = jnp.einsum('hqk,hkd->hqd', attn, v,
                     preferred_element_type=jnp.float32)     # (NH, S, dh)

    # Output projection without concat: per-head (S,dh)@(dh,H), then sum over heads.
    per_head = jnp.einsum('hsd,hdf->hsf', ctx, wo_ref[...],
                          preferred_element_type=jnp.float32)  # (NH, S, H)
    attn_out = jnp.sum(per_head, axis=0)                       # (S, H)

    # --- AddNorm 1 (dropout = identity in eval mode) ---
    y = _layer_norm(attn_out + x, ln1_g_ref[...], ln1_b_ref[...])

    # --- position-wise FFN ---
    hidden = jnp.maximum(
        jnp.dot(y, w1_ref[...], preferred_element_type=jnp.float32) + b1_ref[...], 0.0)
    ffn_out = jnp.dot(hidden, w2_ref[...], preferred_element_type=jnp.float32) + b2_ref[...]

    # --- AddNorm 2 ---
    z = _layer_norm(ffn_out + y, ln2_g_ref[...], ln2_b_ref[...])
    o_ref[0] = z.astype(o_ref.dtype)


# ------------------------------- wrapper --------------------------------------

def transformer_encoder_block(x, valid_lens, params, *, num_heads):
    """x: (B, S, H) float32; valid_lens: (B,) int32 — number of attendable keys per batch."""
    B, S, H = x.shape
    NH = num_heads
    dh = H // NH
    F = params["w1"].shape[1]
    scale = 1.0 / math.sqrt(dh)

    # Head-factor + stack the attention weights once, in plain JAX, outside the kernel:
    #   Wq/Wk/Wv: (H, H) -> (NH, H, dh), stacked to (3*NH, H, dh)  (1/sqrt(dh) folded into Wq)
    #   Wo:       (H, H) -> (NH, dh, H)
    split_in = lambda w: w.reshape(H, NH, dh).transpose(1, 0, 2)
    wqkv = jnp.concatenate([split_in(params["wq"] * scale),
                            split_in(params["wk"]),
                            split_in(params["wv"])], axis=0)         # (3*NH, H, dh)
    wo_r = params["wo"].reshape(NH, dh, H)

    def rep(shape):
        # Replicated (grid-invariant) full-array block. index_map also receives the
        # scalar-prefetch ref positionally.
        return pl.BlockSpec(shape, lambda b, vl: (0,) * len(shape))

    kernel = functools.partial(encoder_block_kernel, num_heads)
    return pl.pallas_call(
        kernel,
        out_shape=jax.ShapeDtypeStruct((B, S, H), jnp.float32),
        grid_spec=pltpu.PrefetchScalarGridSpec(
            num_scalar_prefetch=1,
            grid=(B,),
            in_specs=[
                pl.BlockSpec((1, S, H), lambda b, vl: (b, 0, 0)),   # x
                rep((3 * NH, H, dh)),                               # stacked Wq|Wk|Wv (factored)
                rep((NH, dh, H)),                                   # Wo (factored)
                rep((1, H)), rep((1, H)),                           # ln1 gamma/beta
                rep((H, F)), rep((1, F)),                           # dense1 W/b
                rep((F, H)), rep((1, H)),                           # dense2 W/b
                rep((1, H)), rep((1, H)),                           # ln2 gamma/beta
            ],
            out_specs=pl.BlockSpec((1, S, H), lambda b, vl: (b, 0, 0)),
        ),
        compiler_params=pltpu.CompilerParams(
            dimension_semantics=("parallel",),
            vmem_limit_bytes=32 * 1024 * 1024),
    )(valid_lens.astype(jnp.int32), x,
      wqkv, wo_r,
      params["ln1_g"], params["ln1_b"],
      params["w1"], params["b1"], params["w2"], params["b2"],
      params["ln2_g"], params["ln2_b"])


# --------------------------- pure-JAX reference --------------------------------

def reference_block(x, valid_lens, params, *, num_heads):
    B, S, H = x.shape
    dh = H // num_heads

    def ln(v, g, b, eps=1e-5):
        m = jnp.mean(v, axis=-1, keepdims=True)
        var = jnp.mean((v - m) ** 2, axis=-1, keepdims=True)
        return (v - m) / jnp.sqrt(var + eps) * g + b

    q = x @ params["wq"]
    k = x @ params["wk"]
    v = x @ params["wv"]
    split = lambda t: t.reshape(B, S, num_heads, dh).transpose(0, 2, 1, 3)
    q, k, v = split(q), split(k), split(v)
    scores = jnp.einsum("bhqd,bhkd->bhqk", q, k) / math.sqrt(dh)
    mask = jnp.arange(S)[None, :] < valid_lens[:, None]            # (B, S) key validity
    scores = jnp.where(mask[:, None, None, :], scores, -1000000.0)
    attn = jax.nn.softmax(scores, axis=-1)
    out = jnp.einsum("bhqk,bhkd->bhqd", attn, v)
    out = out.transpose(0, 2, 1, 3).reshape(B, S, H) @ params["wo"]
    y = ln(out + x, params["ln1_g"], params["ln1_b"])
    h = jnp.maximum(y @ params["w1"] + params["b1"], 0.0)
    f = h @ params["w2"] + params["b2"]
    return ln(f + y, params["ln2_g"], params["ln2_b"])


# --------------------------------- main ----------------------------------------

if __name__ == "__main__":
    B, S, H, F, NH = 2, 8, 32, 64, 4   # batch, seq, num_hiddens, ffn_num_hiddens, num_heads

    key = jax.random.PRNGKey(0)
    ks = jax.random.split(key, 10)

    params = {
        "wq": 0.02 * jax.random.normal(ks[0], (H, H), jnp.float32),
        "wk": 0.02 * jax.random.normal(ks[1], (H, H), jnp.float32),
        "wv": 0.02 * jax.random.normal(ks[2], (H, H), jnp.float32),
        "wo": 0.02 * jax.random.normal(ks[3], (H, H), jnp.float32),
        "ln1_g": jnp.ones((1, H), jnp.float32),
        "ln1_b": jnp.zeros((1, H), jnp.float32),
        "w1": 0.02 * jax.random.normal(ks[4], (H, F), jnp.float32),
        "b1": 0.01 * jax.random.normal(ks[5], (1, F), jnp.float32),
        "w2": 0.02 * jax.random.normal(ks[6], (F, H), jnp.float32),
        "b2": 0.01 * jax.random.normal(ks[7], (1, H), jnp.float32),
        "ln2_g": jnp.ones((1, H), jnp.float32),
        "ln2_b": jnp.zeros((1, H), jnp.float32),
    }

    x = jax.random.normal(ks[8], (B, S, H), jnp.float32)
    # Key-validity lengths: batch 0 attends to all 8 keys, batch 1 only to the first 5.
    # TODO(synk): arbitrary (non-prefix) 2D/3D attention masks would need the mask tensor
    # passed as a kernel input instead of scalar-prefetched valid lengths.
    valid_lens = jnp.array([8, 5], dtype=jnp.int32)

    out = transformer_encoder_block(x, valid_lens, params, num_heads=NH)
    out = jax.block_until_ready(out)

    ref = reference_block(x, valid_lens, params, num_heads=NH)
    assert out.shape == (B, S, H)
    # Tolerance slightly looser than f32 exact because the softmax denominator uses the
    # EUP approximate reciprocal (pl.reciprocal(..., approx=True)).
    assert jnp.allclose(out, ref, atol=2e-3, rtol=2e-3), (
        f"max abs err = {jnp.max(jnp.abs(out - ref))}")

    print("KERNEL_OK")
</pallas_src>

<mosaic_0001>
module attributes {stable_mosaic.version = 11 : i64} {
  func.func @encoder_block_kernel(%arg0: i32, %arg1: memref<2xi32, #tpu.memory_space<smem>>, %arg2: memref<1x8x32xf32, #tpu.memory_space<vmem>>, %arg3: memref<12x32x8xf32, #tpu.memory_space<vmem>>, %arg4: memref<4x8x32xf32, #tpu.memory_space<vmem>>, %arg5: memref<1x32xf32, #tpu.memory_space<vmem>>, %arg6: memref<1x32xf32, #tpu.memory_space<vmem>>, %arg7: memref<32x64xf32, #tpu.memory_space<vmem>>, %arg8: memref<1x64xf32, #tpu.memory_space<vmem>>, %arg9: memref<64x32xf32, #tpu.memory_space<vmem>>, %arg10: memref<1x32xf32, #tpu.memory_space<vmem>>, %arg11: memref<1x32xf32, #tpu.memory_space<vmem>>, %arg12: memref<1x32xf32, #tpu.memory_space<vmem>>, %arg13: memref<1x8x32xf32, #tpu.memory_space<vmem>>) attributes {dimension_semantics = [#tpu.dimension_semantics<parallel>], iteration_bounds = array<i64: 2>, scalar_prefetch = 1 : i64, scratch_operands = 0 : i64, tpu.core_type = #tpu.core_type<tc>, window_params = [{transform_indices = @transform_0, window_bounds = array<i64: 1, 8, 32>}, {pipeline_mode = #tpu.pipeline_mode<synchronous>, transform_indices = @transform_1, window_bounds = array<i64: 12, 32, 8>}, {pipeline_mode = #tpu.pipeline_mode<synchronous>, transform_indices = @transform_2, window_bounds = array<i64: 4, 8, 32>}, {pipeline_mode = #tpu.pipeline_mode<synchronous>, transform_indices = @transform_3, window_bounds = array<i64: 1, 32>}, {pipeline_mode = #tpu.pipeline_mode<synchronous>, transform_indices = @transform_4, window_bounds = array<i64: 1, 32>}, {pipeline_mode = #tpu.pipeline_mode<synchronous>, transform_indices = @transform_5, window_bounds = array<i64: 32, 64>}, {pipeline_mode = #tpu.pipeline_mode<synchronous>, transform_indices = @transform_6, window_bounds = array<i64: 1, 64>}, {pipeline_mode = #tpu.pipeline_mode<synchronous>, transform_indices = @transform_7, window_bounds = array<i64: 64, 32>}, {pipeline_mode = #tpu.pipeline_mode<synchronous>, transform_indices = @transform_8, window_bounds = array<i64: 1, 32>}, {pipeline_mode = #tpu.pipeline_mode<synchronous>, transform_indices = @transform_9, window_bounds = array<i64: 1, 32>}, {pipeline_mode = #tpu.pipeline_mode<synchronous>, transform_indices = @transform_10, window_bounds = array<i64: 1, 32>}, {transform_indices = @transform_11, window_bounds = array<i64: 1, 8, 32>}]} {
    %c0 = arith.constant 0 : index
    %c0_0 = arith.constant 0 : index
    %c0_1 = arith.constant 0 : index
    %0 = vector.load %arg2[%c0, %c0_0, %c0_1] : memref<1x8x32xf32, #tpu.memory_space<vmem>>, vector<1x8x32xf32>
    %1 = vector.shape_cast %0 : vector<1x8x32xf32> to vector<8x32xf32>
    %2 = vector.shape_cast %1 : vector<8x32xf32> to vector<1x8x32xf32>
    %3 = vector.broadcast %2 : vector<1x8x32xf32> to vector<12x8x32xf32>
    %c0_2 = arith.constant 0 : index
    %c0_3 = arith.constant 0 : index
    %c0_4 = arith.constant 0 : index
    %4 = vector.load %arg3[%c0_2, %c0_3, %c0_4] : memref<12x32x8xf32, #tpu.memory_space<vmem>>, vector<12x32x8xf32>
    "tpu.trace_start"() <{level = 10 : i32, message = "hsk,hkd->hsd"}> : () -> ()
    %cst = arith.constant dense<0.000000e+00> : vector<12x8x8xf32>
    %5 = tpu.matmul %3, %4, %cst {dimension_numbers = #tpu.dot_dimension_numbers<[2], [1], [1], [2], [0, 0, 0, 1, 1, 2], [0], [0]>} : vector<12x8x32xf32>, vector<12x32x8xf32>, vector<12x8x8xf32> -> vector<12x8x8xf32>
    "tpu.trace_stop"() : () -> ()
    %6 = vector.extract_strided_slice %5 {offsets = [0, 0, 0], sizes = [4, 8, 8], strides = [1, 1, 1]} : vector<12x8x8xf32> to vector<4x8x8xf32>
    %7 = vector.extract_strided_slice %5 {offsets = [4, 0, 0], sizes = [4, 8, 8], strides = [1, 1, 1]} : vector<12x8x8xf32> to vector<4x8x8xf32>
    %8 = vector.extract_strided_slice %5 {offsets = [8, 0, 0], sizes = [4, 8, 8], strides = [1, 1, 1]} : vector<12x8x8xf32> to vector<4x8x8xf32>
    "tpu.trace_start"() <{level = 10 : i32, message = "hqd,hkd->hqk"}> : () -> ()
    %cst_5 = arith.constant dense<0.000000e+00> : vector<4x8x8xf32>
    %9 = tpu.matmul %6, %7, %cst_5 {dimension_numbers = #tpu.dot_dimension_numbers<[2], [2], [1], [1], [0, 0, 0, 1, 1, 1], [0], [0]>} : vector<4x8x8xf32>, vector<4x8x8xf32>, vector<4x8x8xf32> -> vector<4x8x8xf32>
    "tpu.trace_stop"() : () -> ()
    %10 = arith.index_cast %arg0 : i32 to index
    %11 = memref.load %arg1[%10] : memref<2xi32, #tpu.memory_space<smem>>
    %12 = tpu.iota {dimensions = array<i32: 1>} : vector<8x8xi32>
    %13 = vector.broadcast %11 : i32 to vector<8x8xi32>
    %14 = arith.cmpi slt, %12, %13 : vector<8x8xi32>
    %15 = vector.shape_cast %14 : vector<8x8xi1> to vector<1x8x8xi1>
    %cst_6 = arith.constant -1.000000e+06 : f32
    %16 = vector.shape_cast %15 : vector<1x8x8xi1> to vector<1x8x8xi1>
    %17 = vector.broadcast %16 : vector<1x8x8xi1> to vector<4x8x8xi1>
    %18 = vector.broadcast %cst_6 : f32 to vector<4x8x8xf32>
    %19 = arith.select %17, %9, %18 : vector<4x8x8xi1>, vector<4x8x8xf32>
    %cst_7 = arith.constant dense<0xFF800000> : vector<4x8xf32>
    %20 = vector.multi_reduction <maximumf>, %19, %cst_7 [2] : vector<4x8x8xf32> to vector<4x8xf32>
    %21 = vector.shape_cast %20 : vector<4x8xf32> to vector<4x8x1xf32>
    %22 = vector.broadcast %21 : vector<4x8x1xf32> to vector<4x8x8xf32>
    %23 = arith.subf %19, %22 : vector<4x8x8xf32>
    %24 = math.exp %23 : vector<4x8x8xf32>
    %cst_8 = arith.constant dense<0.000000e+00> : vector<4x8xf32>
    %25 = vector.multi_reduction <add>, %24, %cst_8 [2] : vector<4x8x8xf32> to vector<4x8xf32>
    %26 = vector.shape_cast %25 : vector<4x8xf32> to vector<4x8x1xf32>
    %27 = tpu.reciprocal %26 {approx = true} : vector<4x8x1xf32> -> vector<4x8x1xf32>
    %28 = vector.broadcast %27 : vector<4x8x1xf32> to vector<4x8x8xf32>
    %29 = arith.mulf %24, %28 : vector<4x8x8xf32>
    "tpu.trace_start"() <{level = 10 : i32, message = "hqk,hkd->hqd"}> : () -> ()
    %cst_9 = arith.constant dense<0.000000e+00> : vector<4x8x8xf32>
    %30 = tpu.matmul %29, %8, %cst_9 {dimension_numbers = #tpu.dot_dimension_numbers<[2], [1], [1], [2], [0, 0, 0, 1, 1, 2], [0], [0]>} : vector<4x8x8xf32>, vector<4x8x8xf32>, vector<4x8x8xf32> -> vector<4x8x8xf32>
    "tpu.trace_stop"() : () -> ()
    %c0_10 = arith.constant 0 : index
    %c0_11 = arith.constant 0 : index
    %c0_12 = arith.constant 0 : index
    %31 = vector.load %arg4[%c0_10, %c0_11, %c0_12] : memref<4x8x32xf32, #tpu.memory_space<vmem>>, vector<4x8x32xf32>
    "tpu.trace_start"() <{level = 10 : i32, message = "hsd,hdf->hsf"}> : () -> ()
    %cst_13 = arith.constant dense<0.000000e+00> : vector<4x8x32xf32>
    %32 = tpu.matmul %30, %31, %cst_13 {dimension_numbers = #tpu.dot_dimension_numbers<[2], [1], [1], [2], [0, 0, 0, 1, 1, 2], [0], [0]>} : vector<4x8x8xf32>, vector<4x8x32xf32>, vector<4x8x32xf32> -> vector<4x8x32xf32>
    "tpu.trace_stop"() : () -> ()
    %cst_14 = arith.constant dense<0.000000e+00> : vector<8x32xf32>
    %33 = vector.multi_reduction <add>, %32, %cst_14 [0] : vector<4x8x32xf32> to vector<8x32xf32>
    %34 = arith.addf %33, %1 : vector<8x32xf32>
    %c0_15 = arith.constant 0 : index
    %c0_16 = arith.constant 0 : index
    %35 = vector.load %arg5[%c0_15, %c0_16] : memref<1x32xf32, #tpu.memory_space<vmem>>, vector<1x32xf32>
    %c0_17 = arith.constant 0 : index
    %c0_18 = arith.constant 0 : index
    %36 = vector.load %arg6[%c0_17, %c0_18] : memref<1x32xf32, #tpu.memory_space<vmem>>, vector<1x32xf32>
    %cst_19 = arith.constant dense<0.000000e+00> : vector<8xf32>
    %37 = vector.multi_reduction <add>, %34, %cst_19 [1] : vector<8x32xf32> to vector<8xf32>
    %38 = vector.shape_cast %37 : vector<8xf32> to vector<8x1xf32>
    %cst_20 = arith.constant 3.200000e+01 : f32
    %39 = vector.broadcast %cst_20 : f32 to vector<8x1xf32>
    %40 = arith.divf %38, %39 : vector<8x1xf32>
    %41 = vector.broadcast %40 : vector<8x1xf32> to vector<8x32xf32>
    %42 = arith.subf %34, %41 : vector<8x32xf32>
    %43 = arith.mulf %42, %42 : vector<8x32xf32>
    %cst_21 = arith.constant dense<0.000000e+00> : vector<8xf32>
    %44 = vector.multi_reduction <add>, %43, %cst_21 [1] : vector<8x32xf32> to vector<8xf32>
    %45 = vector.shape_cast %44 : vector<8xf32> to vector<8x1xf32>
    %cst_22 = arith.constant 3.200000e+01 : f32
    %46 = vector.broadcast %cst_22 : f32 to vector<8x1xf32>
    %47 = arith.divf %45, %46 : vector<8x1xf32>
    %48 = vector.broadcast %40 : vector<8x1xf32> to vector<8x32xf32>
    %49 = arith.subf %34, %48 : vector<8x32xf32>
    %cst_23 = arith.constant 9.99999974E-6 : f32
    %50 = vector.broadcast %cst_23 : f32 to vector<8x1xf32>
    %51 = arith.addf %47, %50 : vector<8x1xf32>
    %52 = math.rsqrt %51 : vector<8x1xf32>
    %53 = vector.broadcast %52 : vector<8x1xf32> to vector<8x32xf32>
    %54 = arith.mulf %49, %53 : vector<8x32xf32>
    %55 = vector.broadcast %35 : vector<1x32xf32> to vector<8x32xf32>
    %56 = arith.mulf %54, %55 : vector<8x32xf32>
    %57 = vector.broadcast %36 : vector<1x32xf32> to vector<8x32xf32>
    %58 = arith.addf %56, %57 : vector<8x32xf32>
    %c0_24 = arith.constant 0 : index
    %c0_25 = arith.constant 0 : index
    %59 = vector.load %arg7[%c0_24, %c0_25] : memref<32x64xf32, #tpu.memory_space<vmem>>, vector<32x64xf32>
    %cst_26 = arith.constant dense<0.000000e+00> : vector<8x64xf32>
    %60 = tpu.matmul %58, %59, %cst_26 {dimension_numbers = #tpu.dot_dimension_numbers<[1], [0], [0], [1], [0, 0, 1, 1], [], []>} : vector<8x32xf32>, vector<32x64xf32>, vector<8x64xf32> -> vector<8x64xf32>
    %c0_27 = arith.constant 0 : index
    %c0_28 = arith.constant 0 : index
    %61 = vector.load %arg8[%c0_27, %c0_28] : memref<1x64xf32, #tpu.memory_space<vmem>>, vector<1x64xf32>
    %62 = vector.broadcast %61 : vector<1x64xf32> to vector<8x64xf32>
    %63 = arith.addf %60, %62 : vector<8x64xf32>
    %cst_29 = arith.constant 0.000000e+00 : f32
    %64 = vector.broadcast %cst_29 : f32 to vector<8x64xf32>
    %65 = arith.maximumf %63, %64 : vector<8x64xf32>
    %c0_30 = arith.constant 0 : index
    %c0_31 = arith.constant 0 : index
    %66 = vector.load %arg9[%c0_30, %c0_31] : memref<64x32xf32, #tpu.memory_space<vmem>>, vector<64x32xf32>
    %cst_32 = arith.constant dense<0.000000e+00> : vector<8x32xf32>
    %67 = tpu.matmul %65, %66, %cst_32 {dimension_numbers = #tpu.dot_dimension_numbers<[1], [0], [0], [1], [0, 0, 1, 1], [], []>} : vector<8x64xf32>, vector<64x32xf32>, vector<8x32xf32> -> vector<8x32xf32>
    %c0_33 = arith.constant 0 : index
    %c0_34 = arith.constant 0 : index
    %68 = vector.load %arg10[%c0_33, %c0_34] : memref<1x32xf32, #tpu.memory_space<vmem>>, vector<1x32xf32>
    %69 = vector.broadcast %68 : vector<1x32xf32> to vector<8x32xf32>
    %70 = arith.addf %67, %69 : vector<8x32xf32>
    %71 = arith.addf %70, %58 : vector<8x32xf32>
    %c0_35 = arith.constant 0 : index
    %c0_36 = arith.constant 0 : index
    %72 = vector.load %arg11[%c0_35, %c0_36] : memref<1x32xf32, #tpu.memory_space<vmem>>, vector<1x32xf32>
    %c0_37 = arith.constant 0 : index
    %c0_38 = arith.constant 0 : index
    %73 = vector.load %arg12[%c0_37, %c0_38] : memref<1x32xf32, #tpu.memory_space<vmem>>, vector<1x32xf32>
    %cst_39 = arith.constant dense<0.000000e+00> : vector<8xf32>
    %74 = vector.multi_reduction <add>, %71, %cst_39 [1] : vector<8x32xf32> to vector<8xf32>
    %75 = vector.shape_cast %74 : vector<8xf32> to vector<8x1xf32>
    %cst_40 = arith.constant 3.200000e+01 : f32
    %76 = vector.broadcast %cst_40 : f32 to vector<8x1xf32>
    %77 = arith.divf %75, %76 : vector<8x1xf32>
    %78 = vector.broadcast %77 : vector<8x1xf32> to vector<8x32xf32>
    %79 = arith.subf %71, %78 : vector<8x32xf32>
    %80 = arith.mulf %79, %79 : vector<8x32xf32>
    %cst_41 = arith.constant dense<0.000000e+00> : vector<8xf32>
    %81 = vector.multi_reduction <add>, %80, %cst_41 [1] : vector<8x32xf32> to vector<8xf32>
    %82 = vector.shape_cast %81 : vector<8xf32> to vector<8x1xf32>
    %cst_42 = arith.constant 3.200000e+01 : f32
    %83 = vector.broadcast %cst_42 : f32 to vector<8x1xf32>
    %84 = arith.divf %82, %83 : vector<8x1xf32>
    %85 = vector.broadcast %77 : vector<8x1xf32> to vector<8x32xf32>
    %86 = arith.subf %71, %85 : vector<8x32xf32>
    %cst_43 = arith.constant 9.99999974E-6 : f32
    %87 = vector.broadcast %cst_43 : f32 to vector<8x1xf32>
    %88 = arith.addf %84, %87 : vector<8x1xf32>
    %89 = math.rsqrt %88 : vector<8x1xf32>
    %90 = vector.broadcast %89 : vector<8x1xf32> to vector<8x32xf32>
    %91 = arith.mulf %86, %90 : vector<8x32xf32>
    %92 = vector.broadcast %72 : vector<1x32xf32> to vector<8x32xf32>
    %93 = arith.mulf %91, %92 : vector<8x32xf32>
    %94 = vector.broadcast %73 : vector<1x32xf32> to vector<8x32xf32>
    %95 = arith.addf %93, %94 : vector<8x32xf32>
    %c0_44 = arith.constant 0 : index
    %c0_45 = arith.constant 0 : index
    %c0_46 = arith.constant 0 : index
    %96 = vector.load %arg13[%c0_44, %c0_45, %c0_46] : memref<1x8x32xf32, #tpu.memory_space<vmem>>, vector<1x8x32xf32>
    %97 = vector.shape_cast %96 : vector<1x8x32xf32> to vector<8x32xf32>
    %98 = vector.shape_cast %95 : vector<8x32xf32> to vector<1x8x32xf32>
    tpu.vector_store %arg13[%c0_44, %c0_45, %c0_46], %98 {strides = array<i32>} : memref<1x8x32xf32, #tpu.memory_space<vmem>>, vector<1x8x32xf32>,
    return
  }
  func.func @transform_0(%arg0: i32, %arg1: memref<2xi32, #tpu.memory_space<smem>>) -> (i32, i32, i32) {
    %c0_i32 = arith.constant 0 : i32
    %c0_i32_0 = arith.constant 0 : i32
    %c0_i32_1 = arith.constant 0 : i32
    return %arg0, %c0_i32, %c0_i32_0 : i32, i32, i32
  }
  func.func @transform_1(%arg0: i32, %arg1: memref<2xi32, #tpu.memory_space<smem>>) -> (i32, i32, i32) {
    %c0_i32 = arith.constant 0 : i32
    %c0_i32_0 = arith.constant 0 : i32
    %c0_i32_1 = arith.constant 0 : i32
    %c0_i32_2 = arith.constant 0 : i32
    return %c0_i32, %c0_i32_0, %c0_i32_1 : i32, i32, i32
  }
  func.func @transform_2(%arg0: i32, %arg1: memref<2xi32, #tpu.memory_space<smem>>) -> (i32, i32, i32) {
    %c0_i32 = arith.constant 0 : i32
    %c0_i32_0 = arith.constant 0 : i32
    %c0_i32_1 = arith.constant 0 : i32
    %c0_i32_2 = arith.constant 0 : i32
    return %c0_i32, %c0_i32_0, %c0_i32_1 : i32, i32, i32
  }
  func.func @transform_3(%arg0: i32, %arg1: memref<2xi32, #tpu.memory_space<smem>>) -> (i32, i32) {
    %c0_i32 = arith.constant 0 : i32
    %c0_i32_0 = arith.constant 0 : i32
    %c0_i32_1 = arith.constant 0 : i32
    return %c0_i32, %c0_i32_0 : i32, i32
  }
  func.func @transform_4(%arg0: i32, %arg1: memref<2xi32, #tpu.memory_space<smem>>) -> (i32, i32) {
    %c0_i32 = arith.constant 0 : i32
    %c0_i32_0 = arith.constant 0 : i32
    %c0_i32_1 = arith.constant 0 : i32
    return %c0_i32, %c0_i32_0 : i32, i32
  }
  func.func @transform_5(%arg0: i32, %arg1: memref<2xi32, #tpu.memory_space<smem>>) -> (i32, i32) {
    %c0_i32 = arith.constant 0 : i32
    %c0_i32_0 = arith.constant 0 : i32
    %c0_i32_1 = arith.constant 0 : i32
    return %c0_i32, %c0_i32_0 : i32, i32
  }
  func.func @transform_6(%arg0: i32, %arg1: memref<2xi32, #tpu.memory_space<smem>>) -> (i32, i32) {
    %c0_i32 = arith.constant 0 : i32
    %c0_i32_0 = arith.constant 0 : i32
    %c0_i32_1 = arith.constant 0 : i32
    return %c0_i32, %c0_i32_0 : i32, i32
  }
  func.func @transform_7(%arg0: i32, %arg1: memref<2xi32, #tpu.memory_space<smem>>) -> (i32, i32) {
    %c0_i32 = arith.constant 0 : i32
    %c0_i32_0 = arith.constant 0 : i32
    %c0_i32_1 = arith.constant 0 : i32
    return %c0_i32, %c0_i32_0 : i32, i32
  }
  func.func @transform_8(%arg0: i32, %arg1: memref<2xi32, #tpu.memory_space<smem>>) -> (i32, i32) {
    %c0_i32 = arith.constant 0 : i32
    %c0_i32_0 = arith.constant 0 : i32
    %c0_i32_1 = arith.constant 0 : i32
    return %c0_i32, %c0_i32_0 : i32, i32
  }
  func.func @transform_9(%arg0: i32, %arg1: memref<2xi32, #tpu.memory_space<smem>>) -> (i32, i32) {
    %c0_i32 = arith.constant 0 : i32
    %c0_i32_0 = arith.constant 0 : i32
    %c0_i32_1 = arith.constant 0 : i32
    return %c0_i32, %c0_i32_0 : i32, i32
  }
  func.func @transform_10(%arg0: i32, %arg1: memref<2xi32, #tpu.memory_space<smem>>) -> (i32, i32) {
    %c0_i32 = arith.constant 0 : i32
    %c0_i32_0 = arith.constant 0 : i32
    %c0_i32_1 = arith.constant 0 : i32
    return %c0_i32, %c0_i32_0 : i32, i32
  }
  func.func @transform_11(%arg0: i32, %arg1: memref<2xi32, #tpu.memory_space<smem>>) -> (i32, i32, i32) {
    %c0_i32 = arith.constant 0 : i32
    %c0_i32_0 = arith.constant 0 : i32
    %c0_i32_1 = arith.constant 0 : i32
    return %arg0, %c0_i32, %c0_i32_0 : i32, i32, i32
  }
}

</mosaic_0001>

<bundles_post_ra>
// kernel: tpu_custom_call.1
= control target key start
LH: loop header
LB: loop body
LE: loop exit
PB: predicated region body
PF: predicated region fallthrough
CT: control target
= control target key end

     0   :  { %s3700_s0 = inlined_call_operand.vmem [shape: s32[2], index: 0, kind: input, shape index: {}]   ;;  %s3701_s1 = inlined_call_operand.vmem [shape: f32[2,8,32], index: 1, kind: input, shape index: {}]   ;;  %s3702_s2 = inlined_call_operand.vmem [shape: f32[12,32,8], index: 2, kind: input, shape index: {}]   ;;  %s3703_s3 = inlined_call_operand.vmem [shape: f32[4,8,32], index: 3, kind: input, shape index: {}]   ;;  %s3704_s4 = inlined_call_operand.vmem [shape: f32[1,32], index: 4, kind: input, shape index: {}]   ;;  %s3705_s5 = inlined_call_operand.vmem [shape: f32[1,32], index: 5, kind: input, shape index: {}]   ;;  %s3706_s6 = inlined_call_operand.vmem [shape: f32[32,64], index: 6, kind: input, shape index: {}]   ;;  %s3707_s7 = inlined_call_operand.vmem [shape: f32[1,64], index: 7, kind: input, shape index: {}]   ;;  %s3708_s8 = inlined_call_operand.vmem [shape: f32[64,32], index: 8, kind: input, shape index: {}]   ;;  %s3709_s9 = inlined_call_operand.vmem [shape: f32[1,32], index: 9, kind: input, shape index: {}]   ;;  %s3710_s10 = inlined_call_operand.vmem [shape: f32[1,32], index: 10, kind: input, shape index: {}]   ;;  %s3711_s11 = inlined_call_operand.vmem [shape: f32[1,32], index: 11, kind: input, shape index: {}]   ;;  %s3712_s12 = inlined_call_operand.hbm [shape: f32[2,8,32], index: 12, kind: output, shape index: {}]  }
   0x1   :  { %s17_s23 = sshll.u32 %s3700_s0, 4  ;;  %s18_s23 = int_to_ptr.vmem [resolvable:$true] %s17_s23 }
   0x2   :  { %s3065_s24 = scalar_lea.vmem %s18_s23, 16  ;;  %p3070_p1 = scmp.lt.s32.totalorder %s18_s23, %s18_s23 }
   0x3   :  { %p3066_p0 = scmp.ne.s32.totalorder %s18_s23, %s3065_s24  ;;  %p3071_p2 = scmp.lt.s32.totalorder %s3065_s24, %s3065_s24 }
   0x5   :  { %p3072_p3 = por %p3071_p2, %p3070_p1 }
   0x7   :  { %p3073_p4 = pnand %p3072_p3, %p3066_p0 }
   0x9   :  { %3076 = shalt.err (!%p3073_p4)  }
   0xa   :  { %s3143_s25 = smov [#allocation3]  }
   0xb   :  { %20 = dma.vmem_to_smem %s18_s23, 16, %s3143_s25, [#allocation2] }
   0xc   :  { %3121 = dma.done.wait [#allocation2], 16 }
   0xd   :  { %3122 = vsyncadd [#allocation2], 4294967280 }
   0xe   :  { %22 = sfence }
   0xf   :  { %23 = vsyncpa [#allocation5], 0 }
  0x10   :  { %25 = vsyncpa [#allocation5 + $0x1], 0  ;;  %s3216_s26 = smov 0   ;;  %s3218_s27 = smov 0  }
  0x11   :  { %s3220_s0 = smov 0   ;;  %s3222_s28 = smov 0  }
  0x12 LB: > { %3714 = sst [smem:[#allocation8_spill]] %s3137_s0  ;;  %s3237_s29 = sadd.s32 4294967295, %s3141_s28   ;;  %s3141_s28 = sphi %s3222_s28, %s3724_s28   ;;  %s3137_s0 = sphi %s3220_s0, %s3721_s0   ;;  %s3133_s27 = sphi %s3218_s27, %s3723_s27   ;;  %s3129_s26 = sphi %s3216_s26, %s3722_s26  }
  0x13   : > { %s2546_s30 = sadd.s32 4294967294, %s3141_s28   ;;  %s3241_s13 = sadd.s32 1, %s3141_s28  }
  0x14   : > { %s274_s14 = sadd.s32 1, %s3137_s0  ;;  %s271_s15 = ssub.s32 %s3141_s28, %s3241_s13 }
  0x15   : > { %p284_p5 = scmp.ne.s32.totalorder %s3137_s0, %s3133_s27  ;;  %p272_p6 = scmp.eq.s32.totalorder %s271_s15, 0 }
  0x16   : > { %p285_p7 = scmp.eq.s32.totalorder %s3237_s29, 1  ;;  %p290_p8 = scmp.ne.s32.totalorder %s3133_s27, %s3129_s26 }
  0x17   : > { %p291_p9 = scmp.eq.s32.totalorder %s2546_s30, 1  ;;  %p2549_p12 = scmp.ge.s32.totalorder %s3141_s28, 1 }
  0x18   : > { %s3252_s16 = scalar_select %p272_p6, %s3137_s0, %s274_s14  }
  0x19   : > { %p3254_p10 = por %p285_p7, %p284_p5  ;;  %p3258_p11 = por %p291_p9, %p290_p8 }
  0x1a   : > { %3715 = sst [smem:[#allocation9_spill]] %s3252_s16  ;;  %p346_p13 = scmp.lt.s32.totalorder %s3141_s28, 3 }
  0x1c   : > { %p347_p0 = pnand %p2549_p12, %p346_p13 }
  0x1d   : > { %v390_v0 = vld [vmem:[%s3702_s2] sm:$0xff] (!%p347_p0)  ;;  %v391_v1 = vld [vmem:[%s3702_s2 + $0x8] sm:$0xff] (!%p347_p0)  ;;  %v3144_v3 = vmov (!%p347_p0), 0.0|0.0   ;;  %v392_v6 = vld [vmem:[%s3702_s2 + $0x10] sm:$0xff] (!%p347_p0)  ;;  %p385_p1 = scmp.lt.s32.totalorder (!%p347_p0), %s3237_s29, 1  ;;  %vm3145_vm0 = vmmov (!%p347_p0), 0  }
  0x1e   : > { %350 = sbr.rel (%p347_p0) target bundleno = 2313 (0x909), region = 64  ;;  %v394_v2 = vld [vmem:[%s3702_s2 + $0x20] sm:$0xff] (!%p347_p0)  ;;  %2912 = vmatprep.subr.bf16.mxu0 (!%p347_p0), %v3144_v3  ;;  %2918 = vmatprep.subr.bf16.mxu1 (!%p347_p0), %v3144_v3  ;;  %v2913_v4 = vpack.c.bf16 (!%p347_p0), %v391_v1, %v390_v0  ;;  %v395_v5 = vld [vmem:[%s3702_s2 + $0x28] sm:$0xff] (!%p347_p0)  ;;  %v393_v7 = vld [vmem:[%s3702_s2 + $0x18] sm:$0xff] (!%p347_p0)  ;;  %v3146_v11 = vmov (!%p347_p0), 0.0   ;;  %vm438_vm1 = vcmask (!%p347_p0), 261120  }
  0x1f   : > { %v2919_v8 = vpack.c.bf16 (!%p347_p0), %v395_v5, %v394_v2  ;;  %v396_v9 = vld [vmem:[%s3702_s2 + $0x30] sm:$0xff] (!%p347_p0)  ;;  %v397_v10 = vld [vmem:[%s3702_s2 + $0x38] sm:$0xff] (!%p347_p0)  ;;  %2698 = vmatprep.mubr.msk.f32.mxu0 (!%p347_p0), %vm3145_vm0, %v3146_v11  ;;  %2709 = vmatprep.mubr.msk.f32.mxu1 (!%p347_p0), %vm3145_vm0, %v3146_v11  ;;  %v2916_v12 = vpack.c.bf16 (!%p347_p0), %v393_v7, %v392_v6  ;;  %v398_v14 = vld [vmem:[%s3702_s2 + $0x40] sm:$0xff] (!%p347_p0)  ;;  %vm1282_vm2 = vcmask (!%p347_p0), 64512   ;;  %vm2368_vm4 = vcmask (!%p347_p0), 523264   ;;  %s382_s16 = sand.u32 (!%p347_p0), 1, %s3133_s27  }
  0x20   : > { %2914 = vmatpush3.bf16.msra.mxu0 (!%p347_p0), %v2913_v4  ;;  %v2922_v13 = vpack.c.bf16 (!%p347_p0), %v397_v10, %v396_v9  ;;  %v399_v15 = vld [vmem:[%s3702_s2 + $0x48] sm:$0xff] (!%p347_p0)  ;;  %v402_v16 = vld [vmem:[%s3702_s2 + $0x60] sm:$0xff] (!%p347_p0)  ;;  %v400_v21 = vld [vmem:[%s3702_s2 + $0x50] sm:$0xff] (!%p347_p0)  ;;  %s2474_s21 = scalar_lea.sflag (!%p347_p0), [#allocation5], %s382_s16 }
  0x21   : > { %2920 = vmatpush3.bf16.msra.mxu1 (!%p347_p0), %v2919_v8  ;;  %2915 = vmatprep.subr.bf16.mxu0 (!%p347_p0), %v3144_v3  ;;  %v403_v17 = vld [vmem:[%s3702_s2 + $0x68] sm:$0xff] (!%p347_p0)  ;;  %v2925_v19 = vpack.c.bf16 (!%p347_p0), %v399_v15, %v398_v14  ;;  %v401_v22 = vld [vmem:[%s3702_s2 + $0x58] sm:$0xff] (!%p347_p0)  ;;  %v404_v23 = vld [vmem:[%s3702_s2 + $0x70] sm:$0xff] (!%p347_p0) }
  0x22   : > { %2921 = vmatprep.subr.bf16.mxu1 (!%p347_p0), %v3144_v3  ;;  %v2931_v20 = vpack.c.bf16 (!%p347_p0), %v403_v17, %v402_v16  ;;  %v405_v24 = vld [vmem:[%s3702_s2 + $0x78] sm:$0xff] (!%p347_p0)  ;;  %v2928_v25 = vpack.c.bf16 (!%p347_p0), %v401_v22, %v400_v21  ;;  %v406_v27 = vld [vmem:[%s3702_s2 + $0x80] sm:$0xff] (!%p347_p0)  ;;  %v407_v28 = vld [vmem:[%s3702_s2 + $0x88] sm:$0xff] (!%p347_p0) }
  0x23   : > { %v2934_v26 = vpack.c.bf16 (!%p347_p0), %v405_v24, %v404_v23  ;;  %v410_v29 = vld [vmem:[%s3702_s2 + $0xa0] sm:$0xff] (!%p347_p0)  ;;  %v411_v30 = vld [vmem:[%s3702_s2 + $0xa8] sm:$0xff] (!%p347_p0)  ;;  %v2937_v31 = vpack.c.bf16 (!%p347_p0), %v407_v28, %v406_v27  ;;  %v408_v33 = vld [vmem:[%s3702_s2 + $0x90] sm:$0xff] (!%p347_p0) }
  0x24   : > { %2917 = vmatpush3.bf16.msra.mxu0 (!%p347_p0), %v2916_v12  ;;  %v2943_v32 = vpack.c.bf16 (!%p347_p0), %v411_v30, %v410_v29  ;;  %v409_v34 = vld [vmem:[%s3702_s2 + $0x98] sm:$0xff] (!%p347_p0)  ;;  %v412_v35 = vld [vmem:[%s3702_s2 + $0xb0] sm:$0xff] (!%p347_p0)  ;;  %v414_v39 = vld [vmem:[%s3702_s2 + $0xc0] sm:$0xff] (!%p347_p0) }
  0x25   : > { %s386_s25 = scalar_select %p385_p1, %s3237_s29, 1  ;;  %2923 = vmatpush3.bf16.msra.mxu1 %v2922_v13  ;;  %2924 = vmatprep.subr.bf16.mxu0 %v3144_v3  ;;  %v413_v36 = vld [vmem:[%s3702_s2 + $0xb8] sm:$0xff]  ;;  %v2940_v37 = vpack.c.bf16 %v409_v34, %v408_v33  ;;  %v415_v40 = vld [vmem:[%s3702_s2 + $0xc8] sm:$0xff]  ;;  %v418_v41 = vld [vmem:[%s3702_s2 + $0xe0] sm:$0xff] }
  0x26   : > { %2930 = vmatprep.subr.bf16.mxu1 %v3144_v3  ;;  %v2946_v38 = vpack.c.bf16 %v413_v36, %v412_v35  ;;  %v419_v42 = vld [vmem:[%s3702_s2 + $0xe8] sm:$0xff]  ;;  %v2949_v43 = vpack.c.bf16 %v415_v40, %v414_v39  ;;  %v416_v45 = vld [vmem:[%s3702_s2 + $0xd0] sm:$0xff]  ;;  %v417_v46 = vld [vmem:[%s3702_s2 + $0xd8] sm:$0xff] }
  0x27   : > { %s2551_s20 = sshll.u32 %s386_s25, 3  ;;  %v2955_v44 = vpack.c.bf16 %v419_v42, %v418_v41  ;;  %v420_v47 = vld [vmem:[%s3702_s2 + $0xf0] sm:$0xff]  ;;  %v421_v48 = vld [vmem:[%s3702_s2 + $0xf8] sm:$0xff]  ;;  %v2952_v49 = vpack.c.bf16 %v417_v46, %v416_v45  ;;  %v422_v51 = vld [vmem:[%s3702_s2 + $0x100] sm:$0xff]  ;;  %s1587_s25 = sld [smem:[#allocation3 + %s3237_s29]] }
  0x28   : > { %s388_s30 = scalar_lea.vmem %s3701_s1, %s2551_s20  ;;  %v2958_v50 = vpack.c.bf16 %v421_v48, %v420_v47  ;;  %v423_v52 = vld [vmem:[%s3702_s2 + $0x108] sm:$0xff]  ;;  %v424_v54 = vld [vmem:[%s3702_s2 + $0x110] sm:$0xff]  ;;  %v425_v55 = vld [vmem:[%s3702_s2 + $0x118] sm:$0xff]  ;;  %s2550_s20 = sshll.u32 %s382_s16, 3 }
  0x29   : > { %v3313_v18 = vld [vmem:[%s388_s30] sm:$0xff]  ;;  %v2961_v53 = vpack.c.bf16 %v423_v52, %v422_v51  ;;  %v2964_v56 = vpack.c.bf16 %v425_v55, %v424_v54  ;;  %v427_v58 = vld [vmem:[%s3702_s2 + $0x128] sm:$0xff]  ;;  %v428_v63 = vld [vmem:[%s3702_s2 + $0x130] sm:$0xff]  ;;  %s2589_s30 = sshll.u32 %s3237_s29, 7  ;;  %s3147_s29 = smov [#allocation4]  }
  0x2a   : > { %2699 = vmatmul.mubr.msk.f32.vlgmr.msra.gmra.mrb[0].mxu0 %vm438_vm1, %v3313_v18  ;;  %2710 = vmatmul.mubr.msk.f32.vlgmr.msra.gmra.mrb[0].mxu1 %vm438_vm1, %v3313_v18  ;;  %v426_v57 = vld [vmem:[%s3702_s2 + $0x120] sm:$0xff]  ;;  %v431_v61 = vld [vmem:[%s3702_s2 + $0x148] sm:$0xff]  ;;  %v429_v0 = vld [vmem:[%s3702_s2 + $0x138] sm:$0xff]  ;;  %s3657_s0 = scalar_lea.hbm %s3712_s12, %s2589_s30 }
  0x2b   : > { %2926 = vmatpush3.bf16.msra.mxu0 %v2925_v19  ;;  %2932 = vmatpush3.bf16.msra.mxu1 %v2931_v20  ;;  %v430_v59 = vld [vmem:[%s3702_s2 + $0x140] sm:$0xff]  ;;  %v2967_v60 = vpack.c.bf16 %v427_v58, %v426_v57  ;;  %v432_v1 = vld [vmem:[%s3702_s2 + $0x150] sm:$0xff]  ;;  %v2970_v2 = vpack.c.bf16 %v429_v0, %v428_v63  ;;  %v433_v4 = vld [vmem:[%s3702_s2 + $0x158] sm:$0xff] }
  0x2c   : > { %2927 = vmatprep.subr.bf16.mxu0 %v3144_v3  ;;  %2933 = vmatprep.subr.bf16.mxu1 %v3144_v3  ;;  %v2973_v62 = vpack.c.bf16 %v431_v61, %v430_v59  ;;  %v2976_v5 = vpack.c.bf16 %v433_v4, %v432_v1  ;;  %v434_v6 = vld [vmem:[%s3702_s2 + $0x160] sm:$0xff]  ;;  %v435_v7 = vld [vmem:[%s3702_s2 + $0x168] sm:$0xff]  ;;  %v436_v9 = vld [vmem:[%s3702_s2 + $0x170] sm:$0xff] }
  0x2d   : > { %2720 = vmatprep.mubr.msk.f32.mxu0 %vm3145_vm0, %v3146_v11  ;;  %2731 = vmatprep.mubr.msk.f32.mxu1 %vm3145_vm0, %v3146_v11  ;;  %v2979_v8 = vpack.c.bf16 %v435_v7, %v434_v6  ;;  %v437_v10 = vld [vmem:[%s3702_s2 + $0x178] sm:$0xff]  ;;  %v1590_v40 = vstv %s1587_s25  ;;  %s384_s25 = scalar_lea.vmem [#allocation4], %s2550_s20  ;;  %s3081_s20 = sshll.u32 %s3147_s29, 4  ;;  %s3082_s20 = int_to_ptr.vmem [resolvable:$false] %s3081_s20 }
  0x2e   : > { %v2982_v12 = vpack.c.bf16 %v437_v10, %v436_v9  ;;  %s2487_s14 = sshll.u32 %s384_s25, 4  ;;  %s3083_s23 = scalar_lea.vmem %s3082_s20, 256  ;;  %s3659_s14 = int_to_ptr.vmem [resolvable:$true] %s2487_s14 }
  0x2f   : > { %2929 = vmatpush3.bf16.msra.mxu0 %v2928_v25  ;;  %2935 = vmatpush3.bf16.msra.mxu1 %v2934_v26  ;;  %s3077_s22 = scalar_lea.vmem %s3659_s14, 128  ;;  %p3084_p5 = scmp.lt.s32.totalorder %s3659_s14, %s3082_s20 }
  0x30   : > { %2936 = vmatprep.subr.bf16.mxu0 %v3144_v3  ;;  %2942 = vmatprep.subr.bf16.mxu1 %v3144_v3  ;;  %p3078_p2 = scmp.ne.s32.totalorder %s3659_s14, %s3077_s22  ;;  %p3085_p6 = scmp.lt.s32.totalorder %s3083_s23, %s3077_s22 }
  0x32   : > { %2721 = vmatmul.mubr.msk.f32.vlgmr.msra.gmra.mrb[2].mxu0 %vm438_vm1, %v3313_v18  ;;  %2732 = vmatmul.mubr.msk.f32.vlgmr.msra.gmra.mrb[2].mxu1 %vm438_vm1, %v3313_v18  ;;  %p3079_p3 = pnand %p3078_p2, %p3254_p10  ;;  %p3086_p7 = por %p3085_p6, %p3084_p5 }
  0x33   : > { %2938 = vmatpush3.bf16.msra.mxu0 %v2937_v31  ;;  %2944 = vmatpush3.bf16.msra.mxu1 %v2943_v32 }
  0x34   : > { %2939 = vmatprep.subr.bf16.mxu0 %v3144_v3  ;;  %2945 = vmatprep.subr.bf16.mxu1 %v3144_v3  ;;  %p3080_p4 = pneg %p3079_p3 }
  0x35   : > { %2742 = vmatprep.mubr.msk.f32.mxu0 %vm3145_vm0, %v3146_v11  ;;  %2753 = vmatprep.mubr.msk.f32.mxu1 %vm3145_vm0, %v3146_v11 }
  0x36   : > { %p3087_p8 = pnand %p3086_p7, %p3080_p4 }
  0x37   : > { %2941 = vmatpush3.bf16.msra.mxu0 %v2940_v37  ;;  %2947 = vmatpush3.bf16.msra.mxu1 %v2946_v38  ;;  %v1588_v38 = vlaneseq }
  0x38   : > { %2948 = vmatprep.subr.bf16.mxu0 %v3144_v3  ;;  %2954 = vmatprep.subr.bf16.mxu1 %v3144_v3 }
  0x39   : > { %v1589_v39 = vand.u32 127, %v1588_v38 }
  0x3a   : > { %2743 = vmatmul.mubr.msk.f32.vlgmr.msra.gmra.mrb[4].mxu0 %vm438_vm1, %v3313_v18  ;;  %2754 = vmatmul.mubr.msk.f32.vlgmr.msra.gmra.mrb[4].mxu1 %vm438_vm1, %v3313_v18 }
  0x3b   : > { %2950 = vmatpush3.bf16.msra.mxu0 %v2949_v43  ;;  %2956 = vmatpush3.bf16.msra.mxu1 %v2955_v44  ;;  %vm3520_vm3 = vcmp.lt.s32.totalorder %v1589_v39, %v1590_v40 }
  0x3c   : > { %2951 = vmatprep.subr.bf16.mxu0 %v3144_v3  ;;  %2957 = vmatprep.subr.bf16.mxu1 %v3144_v3 }
  0x3d   : > { %2764 = vmatprep.mubr.msk.f32.mxu0 %vm3145_vm0, %v3146_v11  ;;  %2775 = vmatprep.mubr.msk.f32.mxu1 %vm3145_vm0, %v3146_v11 }
  0x3f   : > { %2953 = vmatpush3.bf16.msra.mxu0 %v2952_v49  ;;  %2959 = vmatpush3.bf16.msra.mxu1 %v2958_v50 }
  0x40   : > { %2960 = vmatprep.subr.bf16.mxu0 %v3144_v3  ;;  %2966 = vmatprep.subr.bf16.mxu1 %v3144_v3 }
  0x42   : > { %2765 = vmatmul.mubr.msk.f32.vlgmr.msra.gmra.mrb[6].mxu0 %vm438_vm1, %v3313_v18  ;;  %2776 = vmatmul.mubr.msk.f32.vlgmr.msra.gmra.mrb[6].mxu1 %vm438_vm1, %v3313_v18 }
  0x43   : > { %2962 = vmatpush3.bf16.msra.mxu0 %v2961_v53  ;;  %2786 = vmatprep.mubr.msk.f32.mxu0 %vm3145_vm0, %v3146_v11 }
  0x44   : > { %2963 = vmatprep.subr.bf16.mxu0 %v3144_v3  ;;  %2797 = vmatprep.mubr.msk.f32.mxu1 %vm3145_vm0, %v3146_v11 }
  0x45   : > { %2968 = vmatpush3.bf16.msra.mxu1 %v2967_v60 }
  0x46   : > { %2969 = vmatprep.subr.bf16.mxu1 %v3144_v3 }
  0x47   : > { %2965 = vmatpush3.bf16.msra.mxu0 %v2964_v56 }
  0x48   : > { %2972 = vmatprep.subr.bf16.mxu0 %v3144_v3 }
  0x49   : > { %2971 = vmatpush3.bf16.msra.mxu1 %v2970_v2 }
  0x4a   : > { %2787 = vmatmul.mubr.msk.f32.vlgmr.msra.gmra.mrb[8].mxu0 %vm438_vm1, %v3313_v18  ;;  %2978 = vmatprep.subr.bf16.mxu1 %v3144_v3 }
  0x4b   : > { %2974 = vmatpush3.bf16.msra.mxu0 %v2973_v62  ;;  %2808 = vmatprep.mubr.msk.f32.mxu0 %vm3145_vm0, %v3146_v11 }
  0x4c   : > { %2975 = vmatprep.subr.bf16.mxu0 %v3144_v3  ;;  %2798 = vmatmul.mubr.msk.f32.vlgmr.msra.gmra.mrb[8].mxu1 %vm438_vm1, %v3313_v18 }
  0x4d   : > { %2980 = vmatpush3.bf16.msra.mxu1 %v2979_v8  ;;  %2819 = vmatprep.mubr.msk.f32.mxu1 %vm3145_vm0, %v3146_v11 }
  0x4e   : > { %2981 = vmatprep.subr.bf16.mxu1 %v3144_v3 }
  0x4f   : > { %2977 = vmatpush3.bf16.msra.mxu0 %v2976_v5 }
  0x50   : > { %2822 = vmatprep.subr.mxu0 %v3146_v11 }
  0x51   : > { %2983 = vmatpush3.bf16.msra.mxu1 %v2982_v12 }
  0x52   : > { %2809 = vmatmul.mubr.msk.f32.vlgmr.msra.gmra.mrb[10].mxu0 %vm438_vm1, %v3313_v18  ;;  %2837 = vmatprep.subr.mxu1 %v3146_v11 }
  0x53   : > { %2824 = vmatprep.mubr.msk.f32.mxu0 %vm3145_vm0, %v3146_v11 }
  0x54   : > { %2820 = vmatmul.mubr.msk.f32.vlgmr.msra.gmra.mrb[10].mxu1 %vm438_vm1, %v3313_v18 }
  0x55   : > { %2839 = vmatprep.mubr.msk.f32.mxu1 %vm3145_vm0, %v3146_v11 }
  0xfd   : > { %v508_v13 = vpop.f32.mrb[0].mxu0  ;;  %v578_v15 = vpop.f32.mrb[0].mxu1 }
  0xfe   : > { %v2700_v14 = vpop.f32.mrb[1].mxu0  ;;  %v2711_v16 = vpop.f32.mrb[1].mxu1 }
 0x105   : > { %v648_v17 = vpop.f32.mrb[2].mxu0  ;;  %v718_v20 = vpop.f32.mrb[2].mxu1 }
 0x106   : > { %v2722_v19 = vpop.f32.mrb[3].mxu0  ;;  %v2733_v21 = vpop.f32.mrb[3].mxu1 }
 0x10d   : > { %v788_v22 = vpop.f32.mrb[4].mxu0  ;;  %v858_v24 = vpop.f32.mrb[4].mxu1 }
 0x10e   : > { %v2744_v23 = vpop.f32.mrb[5].mxu0  ;;  %2823 = vmatpush3.xpose.msk.msra.mxu0 %vm1282_vm2, %v788_v22  ;;  %v2755_v25 = vpop.f32.mrb[5].mxu1 }
 0x10f   : > { %2827 = vmatprep.subr.mxu0 %v3146_v11 }
 0x111   : > { %2825 = vmatmul.mubr.msk.f32.vlgmr.msra.gmra.mrb[12].mxu0 %vm1282_vm2, %v508_v13 }
 0x112   : > { %2828 = vmatpush3.xpose.msk.msra.mxu0 %vm1282_vm2, %v858_v24  ;;  %2829 = vmatprep.mubr.msk.f32.mxu0 %vm3145_vm0, %v3146_v11 }
 0x113   : > { %2832 = vmatprep.subr.mxu0 %v3146_v11 }
 0x115   : > { %v928_v26 = vpop.f32.mrb[6].mxu0  ;;  %2830 = vmatmul.mubr.msk.f32.vlgmr.msra.gmra.mrb[14].mxu0 %vm1282_vm2, %v578_v15  ;;  %v998_v27 = vpop.f32.mrb[6].mxu1 }
 0x116   : > { %v2766_v28 = vpop.f32.mrb[7].mxu0  ;;  %2833 = vmatpush3.xpose.msk.msra.mxu0 %vm1282_vm2, %v928_v26  ;;  %2834 = vmatprep.mubr.msk.f32.mxu0 %vm3145_vm0, %v3146_v11  ;;  %v2777_v29 = vpop.f32.mrb[7].mxu1 }
 0x117   : > { %2838 = vmatpush3.xpose.msk.msra.mxu1 %vm1282_vm2, %v998_v27  ;;  %2842 = vmatprep.subr.mxu0 %v3146_v11  ;;  %v1934_v29 = vld [vmem:[%s3703_s3] sm:$0xff] }
 0x118   : > { %2847 = vmatprep.subr.mxu1 %v3146_v11 }
 0x119   : > { %2835 = vmatmul.mubr.msk.f32.vlgmr.msra.gmra.mrb[16].mxu0 %vm1282_vm2, %v648_v17 }
 0x11a   : > { %2840 = vmatmul.mubr.msk.f32.vlgmr.msra.gmra.mrb[12].mxu1 %vm1282_vm2, %v718_v20  ;;  %2844 = vmatprep.mubr.msk.f32.mxu0 %vm3145_vm0, %v3146_v11 }
 0x11b   : > { %2849 = vmatprep.mubr.msk.f32.mxu1 %vm3145_vm0, %v3146_v11 }
 0x11d   : > { %v1068_v30 = vpop.f32.mrb[8].mxu0 }
 0x11e   : > { %v2788_v31 = vpop.f32.mrb[9].mxu0  ;;  %2843 = vmatpush3.msra.mxu0 %v1068_v30  ;;  %v1935_v30 = vld [vmem:[%s3703_s3 + $0x8] sm:$0xff] }
 0x11f   : > { %2852 = vmatprep.subr.mxu0 %v3146_v11  ;;  %v1138_v32 = vpop.f32.mrb[8].mxu1  ;;  %v1936_v31 = vld [vmem:[%s3703_s3 + $0x10] sm:$0xff] }
 0x120   : > { %v2799_v33 = vpop.f32.mrb[9].mxu1  ;;  %2848 = vmatpush3.msra.mxu1 %v1138_v32 }
 0x121   : > { %2857 = vmatprep.subr.mxu1 %v3146_v11 }
 0x125   : > { %v3514_v34 = vpop.f32.mrb[10].mxu0 }
 0x126   : > { %v2810_v35 = vpop.f32.mrb[11].mxu0 }
 0x127   : > { %v3517_v36 = vpop.f32.mrb[10].mxu1 }
 0x128   : > { %v2821_v37 = vpop.f32.mrb[11].mxu1 }
 0x1e4   : > { %v1355_v42 = vpop.f32.mrb[12].mxu0 }
 0x1e5   : > { %v1594_v43 = vsel %vm3520_vm3, %v1355_v42, -1000000.0  ;;  %v2826_v44 = vpop.f32.mrb[13].mxu0 }
 0x1e6   : > { %v1598_v45 = vsel %vm1282_vm2, %v1594_v43, -inf }
 0x1e7   : > { %1599 = vmax.xlane.f32.xlu0 %v1598_v45 }
 0x1e8   : > { %v1431_v46 = vpop.f32.mrb[14].mxu0 }
 0x1e9   : > { %v1595_v47 = vsel %vm3520_vm3, %v1431_v46, -1000000.0  ;;  %v2831_v48 = vpop.f32.mrb[15].mxu0 }
 0x1ea   : > { %v1601_v49 = vsel %vm1282_vm2, %v1595_v47, -inf }
 0x1eb   : > { %1602 = vmax.xlane.f32.xlu0 %v1601_v49 }
 0x1ec   : > { %v1507_v50 = vpop.f32.mrb[16].mxu0 }
 0x1ed   : > { %v1596_v51 = vsel %vm3520_vm3, %v1507_v50, -1000000.0  ;;  %v1583_v52 = vpop.f32.mrb[12].mxu1  ;;  %v2836_v53 = vpop.f32.mrb[17].mxu0 }
 0x1ee   : > { %v2841_v54 = vpop.f32.mrb[13].mxu1  ;;  %v1604_v55 = vsel %vm1282_vm2, %v1596_v51, -inf  ;;  %v1597_v56 = vsel %vm3520_vm3, %v1583_v52, -1000000.0 }
 0x1ef   : > { %1605 = vmax.xlane.f32.xlu1 %v1604_v55  ;;  %v1607_v57 = vsel %vm1282_vm2, %v1597_v56, -inf }
 0x1f3   : > { %1608 = vmax.xlane.f32.xlu1 %v1607_v57 }
 0x274   : > { %v1600_v58 = vpop.xlane.xlu0 %1599 }
 0x275   : > { %v1610_v59 = vsub.f32 %v1594_v43, %v1600_v58 }
 0x277   : > { %v1614_v60 = vmul.f32 1.442695, %v1610_v59 }
 0x278   : > { %v1603_v61 = vpop.xlane.xlu0 %1602 }
 0x279   : > { %3045 = vpow2.f32 %v1614_v60  ;;  %v1611_v62 = vsub.f32 %v1595_v47, %v1603_v61 }
 0x27b   : > { %v1616_v63 = vmul.f32 1.442695, %v1611_v62  ;;  %v2268_v62 = vld [vmem:[%s3706_s6] sm:$0xff] }
 0x27c   : > { %v1606_v0 = vpop.xlane.xlu1 %1605 }
 0x27d   : > { %3047 = vpow2.f32 %v1616_v63  ;;  %v1612_v1 = vsub.f32 %v1596_v51, %v1606_v0  ;;  %v2269_v63 = vld [vmem:[%s3706_s6 + $0x8] sm:$0xff] }
 0x27e   : > { %v2985_v0 = vpack.c.bf16 %v2269_v63, %v2268_v62 }
 0x27f   : > { %v1618_v2 = vmul.f32 1.442695, %v1612_v1  ;;  %v2271_v1 = vld [vmem:[%s3706_s6 + $0x18] sm:$0xff] }
 0x280   : > { %v1609_v4 = vpop.xlane.xlu1 %1608 }
 0x281   : > { %3049 = vpow2.f32 %v1618_v2  ;;  %v1613_v5 = vsub.f32 %v1597_v56, %v1609_v4  ;;  %v2353_v4 = vld [vmem:[%s3708_s8] sm:$0xff] }
 0x283   : > { %v3046_v6 = vpop.eup %3045  ;;  %v1620_v7 = vmul.f32 1.442695, %v1613_v5  ;;  %v2354_v5 = vld [vmem:[%s3708_s8 + $0x8] sm:$0xff] }
 0x284   : > { %v1622_v8 = vsel %vm1282_vm2, %v3046_v6, 0.0 }
 0x285   : > { %3051 = vpow2.f32 %v1620_v7  ;;  %1623 = vadd.xlane.f32.xlu0 %v1622_v8  ;;  %v2991_v7 = vpack.c.bf16 %v2354_v5, %v2353_v4  ;;  %v2356_v8 = vld [vmem:[%s3708_s8 + $0x18] sm:$0xff] }
 0x287   : > { %v3048_v9 = vpop.eup %3047 }
 0x288   : > { %v1625_v10 = vsel %vm1282_vm2, %v3048_v9, 0.0 }
 0x289   : > { %1626 = vadd.xlane.f32.xlu1 %v1625_v10  ;;  %v2357_v10 = vld [vmem:[%s3708_s8 + $0x20] sm:$0xff] }
 0x28b   : > { %v3050_v12 = vpop.eup %3049 }
 0x28c   : > { %v1628_v13 = vsel %vm1282_vm2, %v3050_v12, 0.0 }
 0x28d   : > { %1629 = vadd.xlane.f32.xlu0 %v1628_v13 }
 0x28f   : > { %v3052_v14 = vpop.eup %3051 }
 0x290   : > { %v1631_v15 = vsel %vm1282_vm2, %v3052_v14, 0.0 }
 0x291   : > { %1632 = vadd.xlane.f32.xlu1 %v1631_v15 }
 0x312   : > { %v1624_v16 = vpop.xlane.xlu0 %1623 }
 0x313   : > { %3053 = vrcp.f32 %v1624_v16 }
 0x316   : > { %v1627_v17 = vpop.xlane.xlu1 %1626 }
 0x317   : > { %3055 = vrcp.f32 %v1627_v17 }
 0x31a   : > { %v1630_v19 = vpop.xlane.xlu0 %1629 }
 0x31b   : > { %3057 = vrcp.f32 %v1630_v19  ;;  %v2580_v19 = vld [vmem:[%s3704_s4] ss:$0 sm:$0xff] }
 0x31d   : > { %v3054_v20 = vpop.eup %3053 }
 0x31e   : > { %v1638_v21 = vmul.f32 %v3054_v20, %v3046_v6  ;;  %v1633_v22 = vpop.xlane.xlu1 %1632  ;;  %v2355_v6 = vld [vmem:[%s3708_s8 + $0x10] sm:$0xff] }
 0x31f   : > { %3059 = vrcp.f32 %v1633_v22 }
 0x320   : > { %2845 = vmatmul.mubr.msk.f32.vlgmr.msra.gmra.mrb[18].mxu0 %vm1282_vm2, %v1638_v21  ;;  %v2581_v21 = vld [vmem:[%s3705_s5] ss:$0 sm:$0xff] }
 0x321   : > { %v3056_v23 = vpop.eup %3055  ;;  %2853 = vmatpush3.msra.mxu0 %v3514_v34  ;;  %2854 = vmatprep.mubr.msk.f32.mxu0 %vm3145_vm0, %v3146_v11  ;;  %v1937_v34 = vld [vmem:[%s3703_s3 + $0x18] sm:$0xff] }
 0x322   : > { %v1639_v24 = vmul.f32 %v3056_v23, %v3048_v9  ;;  %2862 = vmatprep.subr.mxu0 %v3146_v11  ;;  %v2994_v9 = vpack.c.bf16 %v2356_v8, %v2355_v6 }
 0x324   : > { %2850 = vmatmul.mubr.msk.f32.vlgmr.msra.gmra.mrb[14].mxu1 %vm1282_vm2, %v1639_v24  ;;  %v2360_v24 = vld [vmem:[%s3708_s8 + $0x38] sm:$0xff] }
 0x325   : > { %v3058_v25 = vpop.eup %3057  ;;  %2858 = vmatpush3.msra.mxu1 %v3517_v36  ;;  %2859 = vmatprep.mubr.msk.f32.mxu1 %vm3145_vm0, %v3146_v11 }
 0x326   : > { %v1640_v26 = vmul.f32 %v3058_v25, %v3050_v12  ;;  %2867 = vmatprep.subr.mxu1 %v3146_v11  ;;  %v2358_v12 = vld [vmem:[%s3708_s8 + $0x28] sm:$0xff] }
 0x327   : > { %v2997_v13 = vpack.c.bf16 %v2358_v12, %v2357_v10 }
 0x328   : > { %2855 = vmatmul.mubr.msk.f32.vlgmr.msra.gmra.mrb[20].mxu0 %vm1282_vm2, %v1640_v26  ;;  %v2582_v26 = vld [vmem:[%s3707_s7] ss:$0 sm:$0xff] }
 0x329   : > { %v3060_v27 = vpop.eup %3059  ;;  %2864 = vmatprep.mubr.msk.f32.mxu0 %vm3145_vm0, %v3146_v11  ;;  %2863 = vmatpush3.msra.mxu0 %v1934_v29 }
 0x32a   : > { %v1641_v28 = vmul.f32 %v3060_v27, %v3052_v14  ;;  %2872 = vmatprep.subr.mxu0 %v3146_v11 }
 0x32c   : > { %2860 = vmatmul.mubr.msk.f32.vlgmr.msra.gmra.mrb[16].mxu1 %vm1282_vm2, %v1641_v28 }
 0x32d   : > { %2869 = vmatprep.mubr.msk.f32.mxu1 %vm3145_vm0, %v3146_v11  ;;  %2868 = vmatpush3.msra.mxu1 %v1935_v30 }
 0x32e   : > { %2877 = vmatprep.subr.mxu1 %v3146_v11 }
 0x3f3   : > { %v1711_v32 = vpop.f32.mrb[18].mxu0 }
 0x3f4   : > { %v2846_v33 = vpop.f32.mrb[19].mxu0  ;;  %2865 = vmatmul.mubr.msk.f32.vlgmr.msra.gmra.mrb[22].mxu0 %vm1282_vm2, %v1711_v32 }
 0x3f5   : > { %2873 = vmatpush3.msra.mxu0 %v1936_v31  ;;  %2874 = vmatprep.mubr.msk.f32.mxu0 %vm3145_vm0, %v3146_v11  ;;  %v2584_v31 = vld [vmem:[%s3709_s9] ss:$0 sm:$0xff] }
 0x3f6   : > { %2984 = vmatprep.subr.bf16.mxu0 %v3144_v3 }
 0x3f7   : > { %v1784_v35 = vpop.f32.mrb[14].mxu1 }
 0x3f8   : > { %v2851_v36 = vpop.f32.mrb[15].mxu1  ;;  %2870 = vmatmul.mubr.msk.f32.vlgmr.msra.gmra.mrb[18].mxu1 %vm1282_vm2, %v1784_v35 }
 0x3f9   : > { %2878 = vmatpush3.msra.mxu1 %v1937_v34  ;;  %2879 = vmatprep.mubr.msk.f32.mxu1 %vm3145_vm0, %v3146_v11 }
 0x3fa   : > { %2990 = vmatprep.subr.bf16.mxu1 %v3144_v3 }
 0x3fb   : > { %v1857_v37 = vpop.f32.mrb[20].mxu0 }
 0x3fc   : > { %v2856_v38 = vpop.f32.mrb[21].mxu0  ;;  %2875 = vmatmul.mubr.msk.f32.vlgmr.msra.gmra.mrb[24].mxu0 %vm1282_vm2, %v1857_v37 }
 0x3fd   : > { %2890 = vmatprep.mubr.msk.f32.mxu0 %vm3145_vm0, %v3146_v11  ;;  %2986 = vmatpush3.bf16.msra.mxu0 %v2985_v0 }
 0x3fe   : > { %2987 = vmatprep.subr.bf16.mxu0 %v3144_v3 }
 0x3ff   : > { %v1930_v39 = vpop.f32.mrb[16].mxu1 }
 0x400   : > { %v2861_v40 = vpop.f32.mrb[17].mxu1  ;;  %2880 = vmatmul.mubr.msk.f32.vlgmr.msra.gmra.mrb[20].mxu1 %vm1282_vm2, %v1930_v39 }
 0x401   : > { %2909 = vmatprep.mubr.msk.f32.mxu1 %vm3145_vm0, %v3146_v11  ;;  %2992 = vmatpush3.bf16.msra.mxu1 %v2991_v7 }
 0x402   : > { %2993 = vmatprep.subr.bf16.mxu1 %v3144_v3 }
 0x405   : > { %2995 = vmatpush3.bf16.msra.mxu1 %v2994_v9 }
 0x406   : > { %2996 = vmatprep.subr.bf16.mxu1 %v3144_v3 }
 0x409   : > { %2998 = vmatpush3.bf16.msra.mxu1 %v2997_v13 }
 0x40a   : > { %2999 = vmatprep.subr.bf16.mxu1 %v3144_v3  ;;  %v2359_v3 = vld [vmem:[%s3708_s8 + $0x30] sm:$0xff] }
 0x40b   : > { %v3000_v25 = vpack.c.bf16 %v2360_v24, %v2359_v3 }
 0x40d   : > { %3001 = vmatpush3.bf16.msra.mxu1 %v3000_v25 }
 0x4c7   : > { %v2007_v41 = vpop.f32.mrb[22].mxu0 }
 0x4c8   : > { %v2866_v42 = vpop.f32.mrb[23].mxu0  ;;  %v2230_v44 = vsel %vm438_vm1, %v2007_v41, 0.0 }
 0x4cb   : > { %v2080_v43 = vpop.f32.mrb[18].mxu1 }
 0x4cc   : > { %v2231_v45 = vsel %vm438_vm1, %v2080_v43, 0.0  ;;  %v2871_v46 = vpop.f32.mrb[19].mxu1 }
 0x4cd   : > { %v2232_v47 = vadd.f32 %v2231_v45, %v2230_v44  ;;  %v2586_v46 = vld [vmem:[%s3710_s10] ss:$0 sm:$0xff] }
 0x4cf   : > { %v2153_v48 = vpop.f32.mrb[24].mxu0 }
 0x4d0   : > { %v2233_v49 = vsel %vm438_vm1, %v2153_v48, 0.0  ;;  %v2876_v50 = vpop.f32.mrb[25].mxu0  ;;  %v2587_v48 = vld [vmem:[%s3711_s11] ss:$0 sm:$0xff] }
 0x4d1   : > { %v2234_v51 = vadd.f32 %v2233_v49, %v2232_v47 }
 0x4d3   : > { %v2226_v52 = vpop.f32.mrb[20].mxu1 }
 0x4d4   : > { %v2235_v53 = vsel %vm438_vm1, %v2226_v52, 0.0  ;;  %v2881_v54 = vpop.f32.mrb[21].mxu1 }
 0x4d5   : > { %v2236_v55 = vadd.f32 %v2235_v53, %v2234_v51 }
 0x4d7   : > { %v2237_v11 = vadd.f32 %v2236_v55, %v3313_v18  ;;  %v2270_v18 = vld [vmem:[%s3706_s6 + $0x10] sm:$0xff] }
 0x4d8   : > { %v2988_v2 = vpack.c.bf16 %v2271_v1, %v2270_v18 }
 0x4d9   : > { %v2240_v56 = vsel %vm438_vm1, %v2237_v11, 0.0 }
 0x4da   : > { %2241 = vadd.xlane.f32.xlu0 %v2240_v56  ;;  %2989 = vmatpush3.bf16.msra.mxu0 %v2988_v2 }
 0x567   : > { %v2242_v57 = vpop.xlane.xlu0 %2241 }
 0x568   : > { %v2244_v58 = vmul.f32 0.03125, %v2242_v57 }
 0x56a   : > { %v2245_v59 = vsub.f32 %v2237_v11, %v2244_v58 }
 0x56c   : > { %v2246_v60 = vmul.f32 %v2245_v59, %v2245_v59 }
 0x56e   : > { %v2247_v61 = vsel %vm438_vm1, %v2246_v60, 0.0 }
 0x56f   : > { %2248 = vadd.xlane.f32.xlu1 %v2247_v61 }
 0x5fc   : > { %v2249_v14 = vpop.xlane.xlu1 %2248 }
 0x5fd   : > { %v2250_v15 = vmul.f32 0.03125, %v2249_v14 }
 0x5ff   : > { %v2251_v16 = vadd.f32 1e-05, %v2250_v15 }
 0x601   : > { %3061 = vrsqrt.f32 %v2251_v16 }
 0x60b   : > { %v3062_v17 = vpop.eup %3061 }
 0x60c   : > { %v2253_v20 = vmul.f32 %v3062_v17, %v2245_v59 }
 0x60e   : > { %v2260_v22 = vmul.f32 %v2580_v19, %v2253_v20 }
 0x610   : > { %v2267_v23 = vadd.f32 %v2581_v21, %v2260_v22 }
 0x612   : > { %2891 = vmatmul.mubr.msk.f32.vlgmr.msra.gmra.mrb[26].mxu0 %vm438_vm1, %v2267_v23 }
 0x6e5   : > { %v2348_v27 = vpop.f32.mrb[26].mxu0 }
 0x6e6   : > { %v2349_v28 = vadd.f32 %v2582_v26, %v2348_v27  ;;  %v2892_v29 = vpop.f32.mrb[27].mxu0 }
 0x6e8   : > { %v2352_v30 = vmax.f32 %v2349_v28, 0.0 }
 0x6ea   : > { %2910 = vmatmul.mubr.msk.f32.vlgmr.msra.gmra.mrb[22].mxu1 %vm2368_vm4, %v2352_v30 }
 0x7bd   : > { %v2438_v32 = vpop.f32.mrb[22].mxu1 }
 0x7be   : > { %v2439_v33 = vadd.f32 %v2584_v31, %v2438_v32  ;;  %v2911_v34 = vpop.f32.mrb[23].mxu1 }
 0x7c0   : > { %v2442_v35 = vadd.f32 %v2439_v33, %v2267_v23 }
 0x7c2   : > { %v2445_v36 = vsel %vm438_vm1, %v2442_v35, 0.0 }
 0x7c3   : > { %2446 = vadd.xlane.f32.xlu0 %v2445_v36 }
 0x850   : > { %v2447_v37 = vpop.xlane.xlu0 %2446 }
 0x851   : > { %v2448_v38 = vmul.f32 0.03125, %v2447_v37 }
 0x853   : > { %v2449_v39 = vsub.f32 %v2442_v35, %v2448_v38 }
 0x855   : > { %v2450_v40 = vmul.f32 %v2449_v39, %v2449_v39 }
 0x857   : > { %v2451_v41 = vsel %vm438_vm1, %v2450_v40, 0.0 }
 0x858   : > { %2452 = vadd.xlane.f32.xlu1 %v2451_v41 }
 0x8e5   : > { %v2453_v42 = vpop.xlane.xlu1 %2452 }
 0x8e6   : > { %v2454_v43 = vmul.f32 0.03125, %v2453_v42 }
 0x8e8   : > { %v2455_v44 = vadd.f32 1e-05, %v2454_v43 }
 0x8ea   : > { %3063 = vrsqrt.f32 %v2455_v44 }
 0x8f4   : > { %v3064_v45 = vpop.eup %3063 }
 0x8f5   : > { %v2457_v47 = vmul.f32 %v3064_v45, %v2449_v39 }
 0x8f7   : > { %v2464_v49 = vmul.f32 %v2586_v46, %v2457_v47 }
 0x8f9   : > { %v2471_v50 = vadd.f32 %v2587_v48, %v2464_v49 }
 0x8fb   : > { %2472 = vst.msk [vmem:[%s384_s25] sm:$0xff] %vm438_vm1, %v2471_v50 }
 0x8fc   : > { %3090 = shalt.err (!%p3087_p8)
}
 0x8fd   : > { %s3091_s16 = scalar_lea.hbm %s3657_s0, 128  ;;  %s3095_s25 = scalar_lea.hbm %s3712_s12, 256 }
 0x8fe   : > { %p3092_p9 = scmp.ne.s32.totalorder %s3657_s0, %s3091_s16  ;;  %p3096_p0 = scmp.lt.u32.totalorder %s3657_s0, %s3712_s12 }
 0x8ff   : > { %p3097_p1 = scmp.lt.u32.totalorder %s3095_s25, %s3091_s16  ;;  %p3099_p3 = scmp.lt.u32.totalorder %s3091_s16, %s3657_s0 }
 0x900   : > { %p3093_p12 = pnand %p3092_p9, %p3254_p10 }
 0x901   : > { %p3098_p2 = por %p3097_p1, %p3096_p0 }
 0x902   : > { %p3094_p13 = pneg %p3093_p12 }
 0x903   : > { %p3100_p4 = por %p3099_p3, %p3098_p2 }
 0x905   : > { %p3101_p5 = pnand %p3100_p4, %p3094_p13 }
 0x907   : > { %3104 = shalt.err (!%p3101_p5)
}
 0x908   : > { %3002 = dma.vmem_to_hbm [thread:$0]  (%p3254_p10), %s3659_s14, 128, %s3657_s0, %s2474_s21  }
 0x909 PF: > { %p3008_p6 = scmp.ge.s32.totalorder %s3141_s28, 2  ;;  %s2499_s22 = sand.u32 1, %s3129_s26  }
 0x90a   : > { %s2500_s29 = scalar_lea.sflag [#allocation5], %s2499_s22 }
 0x90b   : > { %p3005_p7 = pnand %p3008_p6, %p3258_p11 }
 0x90d   : > { %3124 = dma.done.wait (!%p3005_p7), %s2500_s29, 128  }
 0x90e   : > { %3126 = vsyncadd (!%p3005_p7), %s2500_s29, 4294967168  ;;  %s3720_s20 = sld [smem:[#allocation8_spill]]  ;;  %s3721_s0 = sld [smem:[#allocation9_spill]] }
 0x90f   : > { %p28_p8 = scmp.ge.s32.totalorder %s3241_s13, 4   ;;  %s3722_s26 = smov %s3133_s27 }
 0x910   : > { %s3724_s28 = smov %s3241_s13 }
 0x911   :  { %30 = sbr.rel (!%p28_p8) target bundleno = 18 (0x12), region = 99 }
 0x914   : > { %s3723_s27 = smov %s3720_s20 }
 0x918   :  { %2505 = vsyncpa [#allocation5], 1 }
 0x919   :  { %2507 = vsyncpa [#allocation5 + $0x1], 1 }

</bundles_post_ra>
